<compile_context>
chip_gen: v5e
topology: v5e:2x2
jax: 0.10.0
libtpu: 0.0.40
codegen_flags: <defaults>
</compile_context>

<pallas_src>
import jax
import jax.numpy as jnp
from jax import lax
from jax.experimental import pallas as pl
from jax.experimental.pallas import tpu as pltpu


def _pgen_kernel(bias_ref, ctx_ref, dec_ref, inp_ref, w_ref, o_ref):
    # bias_ref [1]       f32, SMEM (scalar prefetch)
    # ctx_ref  [tm, E]   activations (any float dtype), rows on sublanes
    # dec_ref  [tm, D]
    # inp_ref  [tm, X]
    # w_ref    [1, F]    f32, lane-major, columns ordered [ctx | dec | inp]
    # o_ref    [1, tm]   f32, lane-dense (rows on the lane axis)
    E = ctx_ref.shape[1]
    D = dec_ref.shape[1]

    ctx = ctx_ref[...].astype(jnp.float32)
    dec = dec_ref[...].astype(jnp.float32)
    inp = inp_ref[...].astype(jnp.float32)
    w = w_ref[...]                                   # [1, F] f32, one vreg row

    # w_seg @ act^T : transposed-rhs dot_general (flash-attention style),
    # MXU, f32 accumulation -> [1, tm] lane-dense partials (no relayout).
    dn = (((1,), (1,)), ((), ()))
    hp = lax.Precision.HIGHEST                       # full-f32 pass decomposition
    z = lax.dot_general(w[:, :E], ctx, dn,
                        precision=hp, preferred_element_type=jnp.float32)
    z = z + lax.dot_general(w[:, E:E + D], dec, dn,
                            precision=hp, preferred_element_type=jnp.float32)
    z = z + lax.dot_general(w[:, E + D:], inp, dn,
                            precision=hp, preferred_element_type=jnp.float32)
    z = z + bias_ref[0]                              # scalar add from SMEM

    o_ref[...] = jax.nn.sigmoid(z)                   # output stays f32


def pointer_generator(context, decoder_state, decoder_input, weight, bias,
                      *, block_rows=512):
    """p_gen = sigmoid(cat([context, decoder_state, decoder_input], -1) @ W^T + b)

    context        [B, enc_hidden]
    decoder_state  [B, dec_hidden]
    decoder_input  [B, embed]
    weight         [1, F] (torch nn.Linear layout) or [F, 1], F = E + D + X,
                   columns MUST be ordered [context | decoder_state | decoder_input]
                   (the torch module's concat order).
    bias           [1]
    returns        [B, 1] float32
    """
    B, E = context.shape
    D = decoder_state.shape[1]
    X = decoder_input.shape[1]
    F = E + D + X

    w = weight.astype(jnp.float32)                   # keep weight f32
    if w.shape == (F, 1):
        w = w.T
    assert w.shape == (1, F), f"weight must be [1,{F}] or [{F},1], got {weight.shape}"
    b1 = bias.reshape((1,)).astype(jnp.float32)

    # Row tile: one full-array tile for small B; otherwise 512 rows
    # (multiple of 8 for the activation blocks, multiple of 128 for the
    # lane-dense output block).  Sized well under v7x's 32 MiB scoped VMEM.
    tm = B if B <= block_rows else block_rows
    grid = (pl.cdiv(B, tm),)

    out = pl.pallas_call(
        _pgen_kernel,
        out_shape=jax.ShapeDtypeStruct((1, B), jnp.float32),
        grid_spec=pltpu.PrefetchScalarGridSpec(
            num_scalar_prefetch=1,                            # bias -> SMEM
            grid=grid,
            in_specs=[
                pl.BlockSpec((tm, E), lambda i, b: (i, 0)),   # context rows
                pl.BlockSpec((tm, D), lambda i, b: (i, 0)),   # decoder_state rows
                pl.BlockSpec((tm, X), lambda i, b: (i, 0)),   # decoder_input rows
                pl.BlockSpec((1, F), lambda i, b: (0, 0)),    # weight, VMEM-resident
            ],
            out_specs=pl.BlockSpec((1, tm), lambda i, b: (0, i)),
        ),
        compiler_params=pltpu.CompilerParams(
            dimension_semantics=("parallel",)),               # both v7x TCs at large B
    )(b1, context, decoder_state, decoder_input, w)

    # [1, B] -> [B, 1]: identical flat order, pure metadata reshape.
    return out.reshape(B, 1)


def pointer_generator_ref(context, decoder_state, decoder_input, weight, bias):
    """Pure-JAX reference (also the recommended fallback when this op should
    simply be fused by XLA into its producer)."""
    x = jnp.concatenate([context, decoder_state, decoder_input], axis=1)
    x = x.astype(jnp.float32)
    w = weight.astype(jnp.float32).reshape(1, -1)
    z = jnp.dot(x, w.T, precision=lax.Precision.HIGHEST) + bias.astype(jnp.float32)
    return jax.nn.sigmoid(z)


def init_params(key, in_features):
    """Deterministic init matching torch.nn.Linear default (uniform +-1/sqrt(fan_in)).

    Returns weight [1, in_features] (torch layout) and bias [1]."""
    k_w, k_b = jax.random.split(key)
    bound = 1.0 / (in_features ** 0.5)
    weight = jax.random.uniform(k_w, (1, in_features), jnp.float32, -bound, bound)
    bias = jax.random.uniform(k_b, (1,), jnp.float32, -bound, bound)
    return weight, bias


if __name__ == "__main__":
    root = jax.random.PRNGKey(0)

    def run_case(B, E, D, X, key):
        k_ctx, k_dec, k_inp, k_par = jax.random.split(key, 4)
        ctx = jax.random.normal(k_ctx, (B, E), jnp.float32)
        dec = jax.random.normal(k_dec, (B, D), jnp.float32)
        inp = jax.random.normal(k_inp, (B, X), jnp.float32)
        weight, bias = init_params(k_par, E + D + X)

        p_gen = jax.block_until_ready(pointer_generator(ctx, dec, inp, weight, bias))
        ref = pointer_generator_ref(ctx, dec, inp, weight, bias)

        assert p_gen.shape == (B, 1)
        assert p_gen.dtype == jnp.float32
        max_diff = float(jnp.max(jnp.abs(p_gen - ref)))
        # Tolerance covers MXU f32 pass-decomposition vs XLA dot rounding.
        assert max_diff < 1e-2, f"max |diff| = {max_diff}"

    # Decode-step shapes: single tile (grid of 1), the overhead-bound regime.
    run_case(B=8, E=64, D=32, X=16, key=jax.random.fold_in(root, 0))
    # Whole-sequence shapes: row-tiled "parallel" grid (3 tiles of 512 rows),
    # weight VMEM-resident across tiles, lane-dense [1, B] writeback.
    run_case(B=1536, E=64, D=32, X=16, key=jax.random.fold_in(root, 1))

    print("KERNEL_OK")
</pallas_src>

<mosaic_0001>
module attributes {stable_mosaic.version = 11 : i64} {
  func.func @_pgen_kernel(%arg0: i32, %arg1: memref<1xf32, #tpu.memory_space<smem>>, %arg2: memref<8x64xf32, #tpu.memory_space<vmem>>, %arg3: memref<8x32xf32, #tpu.memory_space<vmem>>, %arg4: memref<8x16xf32, #tpu.memory_space<vmem>>, %arg5: memref<1x112xf32, #tpu.memory_space<vmem>>, %arg6: memref<1x8xf32, #tpu.memory_space<vmem>>) attributes {dimension_semantics = [#tpu.dimension_semantics<parallel>], iteration_bounds = array<i64: 1>, scalar_prefetch = 1 : i64, scratch_operands = 0 : i64, tpu.core_type = #tpu.core_type<tc>, window_params = [{transform_indices = @transform_0, window_bounds = array<i64: 8, 64>}, {transform_indices = @transform_1, window_bounds = array<i64: 8, 32>}, {transform_indices = @transform_2, window_bounds = array<i64: 8, 16>}, {pipeline_mode = #tpu.pipeline_mode<synchronous>, transform_indices = @transform_3, window_bounds = array<i64: 1, 112>}, {transform_indices = @transform_4, window_bounds = array<i64: 1, 8>}]} {
    %c0 = arith.constant 0 : index
    %c0_0 = arith.constant 0 : index
    %0 = vector.load %arg2[%c0, %c0_0] : memref<8x64xf32, #tpu.memory_space<vmem>>, vector<8x64xf32>
    %c0_1 = arith.constant 0 : index
    %c0_2 = arith.constant 0 : index
    %1 = vector.load %arg3[%c0_1, %c0_2] : memref<8x32xf32, #tpu.memory_space<vmem>>, vector<8x32xf32>
    %c0_3 = arith.constant 0 : index
    %c0_4 = arith.constant 0 : index
    %2 = vector.load %arg4[%c0_3, %c0_4] : memref<8x16xf32, #tpu.memory_space<vmem>>, vector<8x16xf32>
    %c0_5 = arith.constant 0 : index
    %c0_6 = arith.constant 0 : index
    %3 = vector.load %arg5[%c0_5, %c0_6] : memref<1x112xf32, #tpu.memory_space<vmem>>, vector<1x112xf32>
    %4 = vector.extract_strided_slice %3 {offsets = [0, 0], sizes = [1, 64], strides = [1, 1]} : vector<1x112xf32> to vector<1x64xf32>
    %cst = arith.constant dense<0.000000e+00> : vector<1x8xf32>
    %5 = tpu.matmul %4, %0, %cst {dimension_numbers = #tpu.dot_dimension_numbers<[1], [1], [0], [0], [0, 0, 1, 0], [], []>, precision = #tpu.contract_precision<fp32>} : vector<1x64xf32>, vector<8x64xf32>, vector<1x8xf32> -> vector<1x8xf32>
    %6 = vector.extract_strided_slice %3 {offsets = [0, 64], sizes = [1, 32], strides = [1, 1]} : vector<1x112xf32> to vector<1x32xf32>
    %cst_7 = arith.constant dense<0.000000e+00> : vector<1x8xf32>
    %7 = tpu.matmul %6, %1, %cst_7 {dimension_numbers = #tpu.dot_dimension_numbers<[1], [1], [0], [0], [0, 0, 1, 0], [], []>, precision = #tpu.contract_precision<fp32>} : vector<1x32xf32>, vector<8x32xf32>, vector<1x8xf32> -> vector<1x8xf32>
    %8 = arith.addf %5, %7 : vector<1x8xf32>
    %9 = vector.extract_strided_slice %3 {offsets = [0, 96], sizes = [1, 16], strides = [1, 1]} : vector<1x112xf32> to vector<1x16xf32>
    %cst_8 = arith.constant dense<0.000000e+00> : vector<1x8xf32>
    %10 = tpu.matmul %9, %2, %cst_8 {dimension_numbers = #tpu.dot_dimension_numbers<[1], [1], [0], [0], [0, 0, 1, 0], [], []>, precision = #tpu.contract_precision<fp32>} : vector<1x16xf32>, vector<8x16xf32>, vector<1x8xf32> -> vector<1x8xf32>
    %11 = arith.addf %8, %10 : vector<1x8xf32>
    %c0_9 = arith.constant 0 : index
    %12 = memref.load %arg1[%c0_9] : memref<1xf32, #tpu.memory_space<smem>>
    %13 = vector.broadcast %12 : f32 to vector<1x8xf32>
    %14 = arith.addf %11, %13 : vector<1x8xf32>
    %15 = arith.negf %14 : vector<1x8xf32>
    %16 = math.exp %15 : vector<1x8xf32>
    %cst_10 = arith.constant 1.000000e+00 : f32
    %17 = vector.broadcast %cst_10 : f32 to vector<1x8xf32>
    %18 = arith.addf %17, %16 : vector<1x8xf32>
    %19 = arith.divf %17, %18 : vector<1x8xf32>
    %c0_11 = arith.constant 0 : index
    %c0_12 = arith.constant 0 : index
    %20 = vector.load %arg6[%c0_11, %c0_12] : memref<1x8xf32, #tpu.memory_space<vmem>>, vector<1x8xf32>
    tpu.vector_store %arg6[%c0_11, %c0_12], %19 {strides = array<i32>} : memref<1x8xf32, #tpu.memory_space<vmem>>, vector<1x8xf32>,
    return
  }
  func.func @transform_0(%arg0: i32, %arg1: memref<1xf32, #tpu.memory_space<smem>>) -> (i32, i32) {
    %c0_i32 = arith.constant 0 : i32
    %c0_i32_0 = arith.constant 0 : i32
    return %arg0, %c0_i32 : i32, i32
  }
  func.func @transform_1(%arg0: i32, %arg1: memref<1xf32, #tpu.memory_space<smem>>) -> (i32, i32) {
    %c0_i32 = arith.constant 0 : i32
    %c0_i32_0 = arith.constant 0 : i32
    return %arg0, %c0_i32 : i32, i32
  }
  func.func @transform_2(%arg0: i32, %arg1: memref<1xf32, #tpu.memory_space<smem>>) -> (i32, i32) {
    %c0_i32 = arith.constant 0 : i32
    %c0_i32_0 = arith.constant 0 : i32
    return %arg0, %c0_i32 : i32, i32
  }
  func.func @transform_3(%arg0: i32, %arg1: memref<1xf32, #tpu.memory_space<smem>>) -> (i32, i32) {
    %c0_i32 = arith.constant 0 : i32
    %c0_i32_0 = arith.constant 0 : i32
    %c0_i32_1 = arith.constant 0 : i32
    return %c0_i32, %c0_i32_0 : i32, i32
  }
  func.func @transform_4(%arg0: i32, %arg1: memref<1xf32, #tpu.memory_space<smem>>) -> (i32, i32) {
    %c0_i32 = arith.constant 0 : i32
    %c0_i32_0 = arith.constant 0 : i32
    return %c0_i32, %arg0 : i32, i32
  }
}

</mosaic_0001>

<bundles_post_ra>
// kernel: tpu_custom_call.1
= control target key start
LH: loop header
LB: loop body
LE: loop exit
PB: predicated region body
PF: predicated region fallthrough
CT: control target
= control target key end

     0   :  { %11 = vsyncpa [#allocation5], 0  ;;  %s747_s0 = inlined_call_operand.<no memory space> [shape: f32[1], index: 0, kind: input, shape index: {}]   ;;  %s748_s1 = inlined_call_operand.hbm [shape: f32[8,64], index: 1, kind: input, shape index: {}]   ;;  %s749_s2 = inlined_call_operand.hbm [shape: f32[8,32], index: 2, kind: input, shape index: {}]   ;;  %s750_s3 = inlined_call_operand.hbm [shape: f32[8,16], index: 3, kind: input, shape index: {}]   ;;  %s751_s4 = inlined_call_operand.vmem [shape: f32[1,112], index: 4, kind: input, shape index: {}]   ;;  %s752_s5 = inlined_call_operand.hbm [shape: f32[1,8], index: 5, kind: output, shape index: {}]  }
   0x1   :  { %12 = vsyncpa [#allocation8], 0  ;;  %s30_s20 = sshll.u32 %s749_s2, 4  ;;  %s31_s20 = int_to_ptr.hbm [resolvable:$true] %s30_s20 }
   0x2   :  { %13 = vsyncpa [#allocation6], 0  ;;  %s684_s21 = smov [#allocation7]   ;;  %s19_s25 = sshll.u32 %s748_s1, 4  ;;  %s20_s25 = int_to_ptr.hbm [resolvable:$true] %s19_s25 }
   0x3   :  { %s32_s22 = sshll.u32 %s684_s21, 4  ;;  %s685_s26 = smov [#allocation4]   ;;  %s33_s22 = int_to_ptr.vmem [resolvable:$true] %s32_s22 }
   0x4   :  { %35 = dma.hbm_to_vmem [thread:$0]  %s31_s20, 128, %s33_s22, [#allocation8]  }
   0x5   :  { %s21_s27 = sshll.u32 %s685_s26, 4  ;;  %s41_s30 = sshll.u32 %s750_s3, 4  ;;  %s22_s27 = int_to_ptr.vmem [resolvable:$true] %s21_s27  ;;  %s42_s30 = int_to_ptr.hbm [resolvable:$true] %s41_s30 }
   0x6   :  { %24 = dma.hbm_to_vmem [thread:$0]  %s20_s25, 128, %s22_s27, [#allocation5]  }
   0x7   :  { %s686_s2 = smov [#allocation9]  }
   0x8   :  { %s43_s6 = sshll.u32 %s686_s2, 4  ;;  %s44_s6 = int_to_ptr.vmem [resolvable:$true] %s43_s6 }
   0x9   :  { %46 = dma.hbm_to_vmem [thread:$0]  %s42_s30, 128, %s44_s6, [#allocation8]  }
   0xa   :  { %678 = dma.done.wait [#allocation5], 128  }
   0xb   :  { %679 = vsyncadd [#allocation5], 4294967168 }
   0xc   :  { %680 = dma.done.wait [#allocation8], 256  }
   0xd   :  { %681 = vsyncadd [#allocation8], 4294967040  ;;  %v577_v0 = vld [vmem:[%s751_s4] ss:$0 sm:$0xff]  ;;  %s687_s8 = smov 64   ;;  %s688_s9 = smov 32  }
   0xe   :  { %67 = vrot.lane.b32.xlu0 %v577_v0, %s687_s8  ;;  %vm69_vm0 = vcmask 261120   ;;  %vm221_vm1 = vcmask 523264   ;;  %v61_v1 = vld [vmem:[#allocation4] sm:$0xff]  ;;  %v62_v2 = vld [vmem:[#allocation7] sm:$0xff]  ;;  %vm375_vm2 = vcmask 130048   ;;  %v63_v15 = vld [vmem:[#allocation9] sm:$0xff] }
   0xf   :  { %v73_v3 = vsel %vm69_vm0, %v62_v2, 0  ;;  %v225_v4 = vsel %vm221_vm1, %v61_v1, 0  ;;  %v64_v16 = vld [vmem:[%s751_s4] sm:$0x1]  ;;  %v379_v17 = vsel %vm375_vm2, %v63_v15, 0  ;;  %s689_s12 = smov [#allocation10]  }
  0x10   :  { %v90_v5 = vand.u32 4294901760, %v73_v3  ;;  %v242_v7 = vand.u32 4294901760, %v225_v4  ;;  %v222_v18 = vsel %vm221_vm1, %v64_v16, 0  ;;  %v396_v19 = vand.u32 4294901760, %v379_v17  ;;  %s557_s13 = sshll.u32 %s689_s12, 4  ;;  %s558_s13 = int_to_ptr.vmem [resolvable:$true] %s557_s13 }
  0x11   :  { %v244_v20 = vand.u32 4294901760, %v222_v18  ;;  %vm550_vm6 = vcmask 57344  }
  0x12   :  { %v117_v6 = vsub.f32 %v73_v3, %v90_v5  ;;  %167 = vmatpush.xpose.msra.mxu3 %v90_v5  ;;  %91 = vmatpush.xpose.msra.mxu0 %v90_v5  ;;  %v269_v11 = vsub.f32 %v225_v4, %v242_v7  ;;  %v423_v21 = vsub.f32 %v379_v17, %v396_v19 }
  0x13   :  { %v245_v22 = vsub.f32 %v222_v18, %v244_v20 }
  0x14   :  { %v118_v8 = vand.u32 4294901760, %v117_v6  ;;  %144 = vmatpush.xpose.msra.mxu2 %v117_v6  ;;  %v270_v12 = vand.u32 4294901760, %v269_v11  ;;  %v424_v25 = vand.u32 4294901760, %v423_v21 }
  0x15   :  { %v246_v27 = vand.u32 4294901760, %v245_v22 }
  0x16   :  { %373 = vrot.lane.b32.xlu0 %v577_v0, %s688_s9  ;;  %v119_v9 = vsub.f32 %v117_v6, %v118_v8  ;;  %193 = vmatpush.xpose.msrb.mxu0 %v118_v8  ;;  %v271_v13 = vsub.f32 %v269_v11, %v270_v12  ;;  %v425_v29 = vsub.f32 %v423_v21, %v424_v25 }
  0x17   :  { %v247_v31 = vsub.f32 %v245_v22, %v246_v27 }
  0x18   :  { %243 = vmatpush.xpose.msrb.mxu2 %v242_v7  ;;  %v120_v10 = vand.u32 4294901760, %v119_v9  ;;  %v272_v14 = vand.u32 4294901760, %v271_v13  ;;  %v426_v33 = vand.u32 4294901760, %v425_v29  ;;  %v529_v13 = vstv %s747_s0  ;;  %s559_s0 = sshll.u32 %s752_s5, 4  ;;  %s560_s0 = int_to_ptr.hbm [resolvable:$true] %s559_s0 }
  0x19   :  { %v248_v35 = vand.u32 4294901760, %v247_v31 }
  0x1a   :  { %121 = vmatpush.xpose.msra.mxu1 %v120_v10  ;;  %273 = vmatpush.xpose.msrb.mxu3 %v272_v14 }
  0x1e   :  { %215 = vmatpush.xpose.msrb.mxu1 %v90_v5 }
  0x80   :  { %v68_v23 = vpop.permute.xlu0 %67 }
  0x81   :  { %v70_v24 = vsel %vm69_vm0, %v68_v23, 0 }
  0x82   :  { %v92_v26 = vand.u32 4294901760, %v70_v24 }
  0x84   :  { %v93_v28 = vsub.f32 %v70_v24, %v92_v26  ;;  %123 = vmatmul.f32.vlgmr.msra.gmra.mxu1 %v92_v26 }
  0x85   :  { %319 = vmatpush.xpose.msra.mxu1 %v242_v7 }
  0x86   :  { %147 = vmatmul.f32.vlgmr.msra.gmra.mxu2 %v93_v28  ;;  %v94_v30 = vand.u32 4294901760, %v93_v28 }
  0x87   :  { %345 = vmatpush.xpose.msra.mxu2 %v270_v12 }
  0x88   :  { %171 = vmatmul.f32.vlgmr.msra.gmra.mxu3 %v94_v30  ;;  %v95_v32 = vsub.f32 %v93_v28, %v94_v30  ;;  %v374_v36 = vpop.permute.xlu0 %373 }
  0x89   :  { %367 = vmatpush.xpose.msra.mxu3 %v242_v7  ;;  %v376_v37 = vsel %vm375_vm2, %v374_v36, 0 }
  0x8a   :  { %v96_v34 = vand.u32 4294901760, %v95_v32  ;;  %v398_v38 = vand.u32 4294901760, %v376_v37 }
  0x8c   :  { %97 = vmatmul.f32.vlgmr.msra.gmra.mxu0 %v96_v34  ;;  %217 = vmatmul.f32.vlgmr.msrb.gmra.mxu1 %v92_v26  ;;  %v399_v39 = vsub.f32 %v376_v37, %v398_v38 }
  0x8d   :  { %296 = vmatpush.xpose.msra.mxu0 %v269_v11  ;;  %427 = vmatpush.xpose.msrb.mxu1 %v426_v33 }
  0x8e   :  { %249 = vmatmul.f32.vlgmr.msrb.gmra.mxu2 %v248_v35  ;;  %v400_v40 = vand.u32 4294901760, %v399_v39 }
  0x8f   :  { %450 = vmatpush.xpose.msrb.mxu2 %v423_v21 }
  0x90   :  { %275 = vmatmul.f32.vlgmr.msrb.gmra.mxu3 %v244_v20  ;;  %v401_v41 = vsub.f32 %v399_v39, %v400_v40 }
  0x91   :  { %473 = vmatpush.xpose.msrb.mxu3 %v396_v19 }
  0x92   :  { %v402_v42 = vand.u32 4294901760, %v401_v41 }
  0x94   :  { %195 = vmatmul.f32.vlgmr.msrb.gmra.mxu0 %v92_v26  ;;  %323 = vmatmul.f32.vlgmr.msra.gmra.mxu1 %v246_v27 }
  0x95   :  { %397 = vmatpush.xpose.msrb.mxu0 %v396_v19  ;;  %521 = vmatpush.xpose.msra.mxu1 %v396_v19 }
  0x96   :  { %347 = vmatmul.f32.vlgmr.msra.gmra.mxu2 %v244_v20 }
  0x98   :  { %369 = vmatmul.f32.vlgmr.msra.gmra.mxu3 %v244_v20 }
  0x9c   :  { %299 = vmatmul.f32.vlgmr.msra.gmra.mxu0 %v245_v22  ;;  %429 = vmatmul.f32.vlgmr.msrb.gmra.mxu1 %v398_v38 }
  0x9d   :  { %499 = vmatpush.xpose.msra.mxu0 %v424_v25 }
  0x9e   :  { %453 = vmatmul.f32.vlgmr.msrb.gmra.mxu2 %v399_v39 }
  0xa0   :  { %477 = vmatmul.f32.vlgmr.msrb.gmra.mxu3 %v400_v40 }
  0xa4   :  { %403 = vmatmul.f32.vlgmr.msrb.gmra.mxu0 %v402_v42  ;;  %523 = vmatmul.f32.vlgmr.msra.gmra.mxu1 %v398_v38 }
  0xac   :  { %501 = vmatmul.f32.vlgmr.msra.gmra.mxu0 %v398_v38 }
 0x101   :  { %v124_v43 = vpop.f32.mrf.mxu1 }
 0x109   :  { %v98_v44 = vpop.f32.mrf.mxu0  ;;  %v148_v45 = vpop.f32.mrf.mxu2 }
 0x10a   :  { %v125_v46 = vadd.f32 %v124_v43, %v98_v44  ;;  %v218_v49 = vpop.f32.mrf.mxu1 }
 0x10b   :  { %v172_v47 = vpop.f32.mrf.mxu3 }
 0x10c   :  { %v149_v48 = vadd.f32 %v148_v45, %v125_v46 }
 0x10e   :  { %v173_v50 = vadd.f32 %v172_v47, %v149_v48 }
 0x111   :  { %v196_v51 = vpop.f32.mrf.mxu0  ;;  %v250_v52 = vpop.f32.mrf.mxu2 }
 0x112   :  { %v197_v53 = vadd.f32 %v196_v51, %v173_v50  ;;  %v324_v56 = vpop.f32.mrf.mxu1 }
 0x113   :  { %v276_v54 = vpop.f32.mrf.mxu3 }
 0x114   :  { %v219_v55 = vadd.f32 %v218_v49, %v197_v53 }
 0x116   :  { %v251_v57 = vadd.f32 %v250_v52, %v219_v55 }
 0x118   :  { %v277_v60 = vadd.f32 %v276_v54, %v251_v57 }
 0x119   :  { %v300_v58 = vpop.f32.mrf.mxu0  ;;  %v348_v59 = vpop.f32.mrf.mxu2 }
 0x11a   :  { %v301_v62 = vadd.f32 %v300_v58, %v277_v60  ;;  %v430_v63 = vpop.f32.mrf.mxu1 }
 0x11b   :  { %v370_v61 = vpop.f32.mrf.mxu3 }
 0x11c   :  { %v325_v3 = vadd.f32 %v324_v56, %v301_v62 }
 0x11e   :  { %v349_v6 = vadd.f32 %v348_v59, %v325_v3 }
 0x120   :  { %v371_v11 = vadd.f32 %v370_v61, %v349_v6 }
 0x121   :  { %v404_v0 = vpop.f32.mrf.mxu0  ;;  %v454_v2 = vpop.f32.mrf.mxu2 }
 0x122   :  { %v431_v1 = vadd.f32 %v430_v63, %v404_v0  ;;  %v524_v10 = vpop.f32.mrf.mxu1 }
 0x123   :  { %v478_v5 = vpop.f32.mrf.mxu3 }
 0x124   :  { %v455_v4 = vadd.f32 %v454_v2, %v431_v1 }
 0x126   :  { %v479_v7 = vadd.f32 %v478_v5, %v455_v4 }
 0x129   :  { %v502_v8 = vpop.f32.mrf.mxu0 }
 0x12a   :  { %v503_v9 = vadd.f32 %v502_v8, %v479_v7 }
 0x12c   :  { %v525_v12 = vadd.f32 %v524_v10, %v503_v9 }
 0x12e   :  { %v527_v14 = vadd.f32 %v525_v12, %v371_v11 }
 0x130   :  { %v530_v15 = vadd.f32 %v529_v13, %v527_v14 }
 0x132   :  { %v570_v16 = vmul.f32 -1.442695, %v530_v15 }
 0x134   :  { %578 = vpow2.f32 %v570_v16 }
 0x13a   :  { %v579_v17 = vpop.eup %578 }
 0x13b   :  { %v534_v18 = vadd.f32 1.0, %v579_v17 }
 0x13d   :  { %580 = vrcp.f32 %v534_v18  ;;  %v546_v22 = vand.u32 2147483648, %v534_v18  ;;  %v544_v24 = vand.u32 2147483647, %v534_v18  ;;  %vm540_vm4 = vweird.f32 %v534_v18 }
 0x13f   :  { %v547_v26 = vor.u32 1.1754944e-38, %v546_v22  ;;  %vm545_vm7 = vcmp.eq.f32.partialorder %v544_v24, 8.507059e+37 }
 0x143   :  { %v581_v19 = vpop.eup %580 }
 0x144   :  { %v536_v20 = vmul.f32 %v581_v19, %v534_v18  ;;  %vm541_vm3 = vweird.f32 %v581_v19 }
 0x145   :  { %vm542_vm5 = vmor %vm540_vm4, %vm541_vm3 }
 0x146   :  { %v537_v21 = vsub.f32 1.0, %v536_v20 }
 0x148   :  { %v538_v23 = vmul.f32 %v581_v19, %v537_v21 }
 0x14a   :  { %v539_v25 = vadd.f32 %v581_v19, %v538_v23 }
 0x14c   :  { %v543_v27 = vsel %vm542_vm5, %v581_v19, %v539_v25 }
 0x14d   :  { %v548_v28 = vsel %vm545_vm7, %v547_v26, %v543_v27 }
 0x14e   :  { %551 = vst.msk [vmem:[#allocation10] sm:$0x1] %vm550_vm6, %v548_v28 }
 0x14f   :  { %562 = dma.vmem_to_hbm [thread:$0]  %s558_s13, 16, %s560_s0, [#allocation6]  }
 0x150   :  { %682 = dma.done.wait [#allocation6], 16  }
 0x151   :  { %683 = vsyncadd [#allocation6], 4294967280 }
 0x152   :  { %567 = vsyncpa [#allocation5], 1 }
 0x153   :  { %568 = vsyncpa [#allocation8], 1 }
 0x154   :  { %569 = vsyncpa [#allocation6], 1 }

</bundles_post_ra>
